<compile_context>
chip_gen: v6e
topology: v6e:2x2x1
jax: 0.10.0
libtpu: 0.0.40
codegen_flags: <defaults>
</compile_context>

<pallas_src>
from functools import partial

import jax
import jax.numpy as jnp
from jax.experimental import pallas as pl
from jax.experimental.pallas import tpu as pltpu


def _round_up(x, m):
    return ((x + m - 1) // m) * m


def _decoder_kernel(wemb_ref, pemb_ref, wqkv_ref, wff_ref, bias_ref, out_ref,
                    *, num_heads):
    f32 = jnp.float32
    wemb = wemb_ref[...]                       # (Wseq, Wemb_dim)
    pemb = pemb_ref[...]                       # (Pseq, Pemb_dim)

    Wseq, Wemb_dim = wemb.shape
    Pseq, Pemb_dim = pemb.shape
    new_dim = wqkv_ref.shape[1]
    H = num_heads

    # ---- packed parameter slabs (static, sublane-aligned row slices) ----
    wq = wqkv_ref[0:Wemb_dim, :]                               # 1/sqrt(hd) pre-folded
    wk = wqkv_ref[Wemb_dim:Wemb_dim + Pemb_dim, :]
    wv = wqkv_ref[Wemb_dim + Pemb_dim:Wemb_dim + 2 * Pemb_dim, :]
    blockdiag = wqkv_ref[Wemb_dim + 2 * Pemb_dim:, :]          # (H*Pseq, new_dim) 0/1

    bq = bias_ref[0:1, 0:new_dim]
    bk = bias_ref[1:2, 0:new_dim]
    bv = bias_ref[2:3, 0:new_dim]
    b1 = bias_ref[3:4, :]                                      # (1, FFW)
    b2 = bias_ref[4:5, :]                                      # (1, FFW)

    # ---- projections (one lane-dense matmul each) ----
    q = jnp.dot(wemb, wq, preferred_element_type=f32) + bq     # (Wseq, new_dim)
    k = jnp.dot(pemb, wk, preferred_element_type=f32) + bk     # (Pseq, new_dim)
    v = jnp.dot(pemb, wv, preferred_element_type=f32) + bv     # (Pseq, new_dim)

    # ---- head-merged attention: no per-head slices, no head concat ----
    k_pad = jnp.concatenate([k] * H, axis=0) * blockdiag       # (H*Pseq, new_dim)
    v_pad = jnp.concatenate([v] * H, axis=0) * blockdiag       # (H*Pseq, new_dim)

    # scores for ALL heads in one MXU push; contract last dims (no transpose of k)
    att = jax.lax.dot_general(q, k_pad, (((1,), (1,)), ((), ())),
                              preferred_element_type=f32)      # (Wseq, H*Pseq)

    # additive causal-style mask (triu, diagonal=1) computed once, tiled per head
    row = jax.lax.broadcasted_iota(jnp.int32, (Wseq, Pseq), 0)
    col = jax.lax.broadcasted_iota(jnp.int32, (Wseq, Pseq), 1)
    neg = jnp.where(col > row, f32(-1e9), f32(0.0))            # (Wseq, Pseq)
    att = att + jnp.concatenate([neg] * H, axis=1)             # (Wseq, H*Pseq)

    # one softmax pass for all heads (global row max is a valid per-head shift)
    m = jnp.max(att, axis=-1, keepdims=True)                   # (Wseq, 1)
    e = jnp.exp(att - m)                                       # single exp / reduce
    denom = jnp.dot(e, blockdiag, preferred_element_type=f32)  # per-head sums, (Wseq, new_dim)
    ctx = jnp.dot(e, v_pad, preferred_element_type=f32)        # (Wseq, new_dim)
    sim_mat = ctx / denom                                      # exact divide (review)

    # ---- feed-forward, zero-padded to lane-dense FFW so the store is unmasked ----
    w1 = wff_ref[0:Wemb_dim, :]                                # (Wemb_dim, FFW)
    w2 = wff_ref[Wemb_dim:, :]                                 # (FFW, FFW)
    hdn = jnp.maximum(jnp.dot(sim_mat, w1, preferred_element_type=f32) + b1, 0.0)
    out_ref[...] = jnp.dot(hdn, w2, preferred_element_type=f32) + b2


def decoder_forward(wemb, pemb, params, num_heads):
    Wseq, Wemb_dim = wemb.shape
    Pseq, Pemb_dim = pemb.shape
    wq, bq = params["wq"], params["bq"]
    wk, bk = params["wk"], params["bk"]
    wv, bv = params["wv"], params["bv"]
    w1, b1 = params["w1"], params["b1"]
    w2, b2 = params["w2"], params["b2"]

    new_dim = wq.shape[1]
    hidden_ff = w1.shape[1]
    assert new_dim % num_heads == 0
    assert Wemb_dim % num_heads == 0 and Pemb_dim % num_heads == 0
    hd = new_dim // num_heads
    # The PyTorch module only typechecks when new_dim == Wemb_dim (FF takes sim_mat).
    assert new_dim == Wemb_dim

    # ---- one-time parameter packing (would be a load-time transform in a real model) ----
    inv_scale = jnp.float32(1.0 / (hd ** 0.5))

    # block-diagonal 0/1 head mask: row h*Pseq+p keeps only head h's lanes
    r_head = (jnp.arange(num_heads * Pseq, dtype=jnp.int32) // Pseq)[:, None]
    c_head = (jnp.arange(new_dim, dtype=jnp.int32) // hd)[None, :]
    blockdiag = (r_head == c_head).astype(jnp.float32)          # (H*Pseq, new_dim)

    # slab 1: common lane width = new_dim
    slab_qkv = jnp.concatenate([wq * inv_scale, wk, wv, blockdiag], axis=0)

    # slab 2: FF weights, zero-padded to a lane-dense width (multiple of 128)
    FFW = max(_round_up(hidden_ff, 128), _round_up(Wemb_dim, 128))
    w1_pad = jnp.zeros((Wemb_dim, FFW), jnp.float32).at[:, :hidden_ff].set(w1)
    w2_pad = jnp.zeros((FFW, FFW), jnp.float32).at[:hidden_ff, :Wemb_dim].set(w2)
    slab_ff = jnp.concatenate([w1_pad, w2_pad], axis=0)          # (Wemb_dim+FFW, FFW)

    # slab 3: all biases in one array
    def _pad_row(b):
        return jnp.zeros((1, FFW), jnp.float32).at[0, :b.shape[0]].set(b)
    bias_slab = jnp.concatenate(
        [_pad_row(bq * inv_scale), _pad_row(bk), _pad_row(bv),
         _pad_row(b1), _pad_row(b2)], axis=0)                    # (5, FFW)

    vmem = pl.BlockSpec(memory_space=pltpu.MemorySpace.VMEM)
    out_pad = pl.pallas_call(
        partial(_decoder_kernel, num_heads=num_heads),
        out_shape=jax.ShapeDtypeStruct((Wseq, FFW), jnp.float32),
        in_specs=[vmem] * 5,
        out_specs=vmem,
    )(wemb, pemb, slab_qkv, slab_ff, bias_slab)

    # undo the lane padding of the final (lane-dense) store
    return out_pad[:, :Wemb_dim]


def _reference(wemb, pemb, params, num_heads):
    """Pure-JAX reference mirroring the PyTorch forward."""
    Wseq, Wemb_dim = wemb.shape
    Pseq, _ = pemb.shape
    new_dim = params["wq"].shape[1]
    hd = new_dim // num_heads
    q = (wemb @ params["wq"] + params["bq"]).reshape(Wseq, num_heads, hd).transpose(1, 0, 2)
    k = (pemb @ params["wk"] + params["bk"]).reshape(Pseq, num_heads, hd).transpose(1, 0, 2)
    v = (pemb @ params["wv"] + params["bv"]).reshape(Pseq, num_heads, hd).transpose(1, 0, 2)
    att = jnp.einsum("hqd,hkd->hqk", q, k) / (hd ** 0.5)
    mask = jnp.triu(jnp.ones_like(att), k=1) * -1e9
    soft = jax.nn.softmax(att + mask, axis=-1)
    sim = jnp.einsum("hqk,hkd->hqd", soft, v).transpose(1, 0, 2).reshape(Wseq, new_dim)
    h = jnp.maximum(sim @ params["w1"] + params["b1"], 0.0)
    return h @ params["w2"] + params["b2"]


def _init_params(key, Wemb_dim, Pemb_dim, new_dim, hidden_dim_ff):
    ks = jax.random.split(key, 10)

    def lin(kw, kb, fan_in, fan_out):
        bound = 1.0 / (fan_in ** 0.5)
        w = jax.random.uniform(kw, (fan_in, fan_out), jnp.float32, -bound, bound)
        b = jax.random.uniform(kb, (fan_out,), jnp.float32, -bound, bound)
        return w, b

    wq, bq = lin(ks[0], ks[1], Wemb_dim, new_dim)
    wk, bk = lin(ks[2], ks[3], Pemb_dim, new_dim)
    wv, bv = lin(ks[4], ks[5], Pemb_dim, new_dim)
    w1, b1 = lin(ks[6], ks[7], Wemb_dim, hidden_dim_ff)
    w2, b2 = lin(ks[8], ks[9], hidden_dim_ff, Wemb_dim)
    return dict(wq=wq, bq=bq, wk=wk, bk=bk, wv=wv, bv=bv,
                w1=w1, b1=b1, w2=w2, b2=b2)


if __name__ == "__main__":
    # Small shapes consistent with the module's forward.
    Wseq, Pseq = 8, 16
    Wemb_dim, Pemb_dim = 32, 48
    new_dim = 32          # must equal Wemb_dim for the feedforward to typecheck
    num_heads = 4
    hidden_dim_ff = 64
    voc_size = 100        # unused by forward (as in the PyTorch module)

    key = jax.random.PRNGKey(0)
    k_w, k_p, k_par = jax.random.split(key, 3)
    wemb = jax.random.normal(k_w, (Wseq, Wemb_dim), jnp.float32)
    pemb = jax.random.normal(k_p, (Pseq, Pemb_dim), jnp.float32)
    params = _init_params(k_par, Wemb_dim, Pemb_dim, new_dim, hidden_dim_ff)

    out = decoder_forward(wemb, pemb, params, num_heads)
    out = jax.block_until_ready(out)

    ref = _reference(wemb, pemb, params, num_heads)
    assert out.shape == (Wseq, Wemb_dim)
    # Exact-divide softmax -> tolerance back at the ~1e-5 level.
    assert jnp.allclose(out, ref, rtol=1e-5, atol=1e-5), \
        float(jnp.max(jnp.abs(out - ref)))

    print("KERNEL_OK")
</pallas_src>

<mosaic_0001>
module attributes {stable_mosaic.version = 11 : i64} {
  func.func @_decoder_kernel(%arg0: memref<8x32xf32, #tpu.memory_space<vmem>>, %arg1: memref<16x48xf32, #tpu.memory_space<vmem>>, %arg2: memref<192x32xf32, #tpu.memory_space<vmem>>, %arg3: memref<160x128xf32, #tpu.memory_space<vmem>>, %arg4: memref<5x128xf32, #tpu.memory_space<vmem>>, %arg5: memref<8x128xf32, #tpu.memory_space<vmem>>) attributes {dimension_semantics = [], scalar_prefetch = 0 : i64, scratch_operands = 0 : i64, tpu.core_type = #tpu.core_type<tc>} {
    %c0 = arith.constant 0 : index
    %c0_0 = arith.constant 0 : index
    %0 = vector.load %arg0[%c0, %c0_0] : memref<8x32xf32, #tpu.memory_space<vmem>>, vector<8x32xf32>
    %c0_1 = arith.constant 0 : index
    %c0_2 = arith.constant 0 : index
    %1 = vector.load %arg1[%c0_1, %c0_2] : memref<16x48xf32, #tpu.memory_space<vmem>>, vector<16x48xf32>
    %c0_3 = arith.constant 0 : index
    %c0_4 = arith.constant 0 : index
    %2 = vector.load %arg2[%c0_3, %c0_4] : memref<192x32xf32, #tpu.memory_space<vmem>>, vector<32x32xf32>
    %c32 = arith.constant 32 : index
    %c0_5 = arith.constant 0 : index
    %3 = vector.load %arg2[%c32, %c0_5] : memref<192x32xf32, #tpu.memory_space<vmem>>, vector<48x32xf32>
    %c80 = arith.constant 80 : index
    %c0_6 = arith.constant 0 : index
    %4 = vector.load %arg2[%c80, %c0_6] : memref<192x32xf32, #tpu.memory_space<vmem>>, vector<48x32xf32>
    %c128 = arith.constant 128 : index
    %c0_7 = arith.constant 0 : index
    %5 = vector.load %arg2[%c128, %c0_7] : memref<192x32xf32, #tpu.memory_space<vmem>>, vector<64x32xf32>
    %c0_8 = arith.constant 0 : index
    %c0_9 = arith.constant 0 : index
    %6 = vector.load %arg4[%c0_8, %c0_9] : memref<5x128xf32, #tpu.memory_space<vmem>>, vector<1x32xf32>
    %c1 = arith.constant 1 : index
    %c0_10 = arith.constant 0 : index
    %7 = vector.load %arg4[%c1, %c0_10] : memref<5x128xf32, #tpu.memory_space<vmem>>, vector<1x32xf32>
    %c2 = arith.constant 2 : index
    %c0_11 = arith.constant 0 : index
    %8 = vector.load %arg4[%c2, %c0_11] : memref<5x128xf32, #tpu.memory_space<vmem>>, vector<1x32xf32>
    %c3 = arith.constant 3 : index
    %c0_12 = arith.constant 0 : index
    %9 = vector.load %arg4[%c3, %c0_12] : memref<5x128xf32, #tpu.memory_space<vmem>>, vector<1x128xf32>
    %c4 = arith.constant 4 : index
    %c0_13 = arith.constant 0 : index
    %10 = vector.load %arg4[%c4, %c0_13] : memref<5x128xf32, #tpu.memory_space<vmem>>, vector<1x128xf32>
    %cst = arith.constant dense<0.000000e+00> : vector<8x32xf32>
    %11 = tpu.matmul %0, %2, %cst {dimension_numbers = #tpu.dot_dimension_numbers<[1], [0], [0], [1], [0, 0, 1, 1], [], []>} : vector<8x32xf32>, vector<32x32xf32>, vector<8x32xf32> -> vector<8x32xf32>
    %12 = vector.broadcast %6 : vector<1x32xf32> to vector<8x32xf32>
    %13 = arith.addf %11, %12 : vector<8x32xf32>
    %cst_14 = arith.constant dense<0.000000e+00> : vector<16x32xf32>
    %14 = tpu.matmul %1, %3, %cst_14 {dimension_numbers = #tpu.dot_dimension_numbers<[1], [0], [0], [1], [0, 0, 1, 1], [], []>} : vector<16x48xf32>, vector<48x32xf32>, vector<16x32xf32> -> vector<16x32xf32>
    %15 = vector.broadcast %7 : vector<1x32xf32> to vector<16x32xf32>
    %16 = arith.addf %14, %15 : vector<16x32xf32>
    %cst_15 = arith.constant dense<0.000000e+00> : vector<16x32xf32>
    %17 = tpu.matmul %1, %4, %cst_15 {dimension_numbers = #tpu.dot_dimension_numbers<[1], [0], [0], [1], [0, 0, 1, 1], [], []>} : vector<16x48xf32>, vector<48x32xf32>, vector<16x32xf32> -> vector<16x32xf32>
    %18 = vector.broadcast %8 : vector<1x32xf32> to vector<16x32xf32>
    %19 = arith.addf %17, %18 : vector<16x32xf32>
    %20 = tpu.concatenate %16, %16, %16, %16 in 0 : vector<16x32xf32>, vector<16x32xf32>, vector<16x32xf32>, vector<16x32xf32> -> vector<64x32xf32>
    %21 = arith.mulf %20, %5 : vector<64x32xf32>
    %22 = tpu.concatenate %19, %19, %19, %19 in 0 : vector<16x32xf32>, vector<16x32xf32>, vector<16x32xf32>, vector<16x32xf32> -> vector<64x32xf32>
    %23 = arith.mulf %22, %5 : vector<64x32xf32>
    %cst_16 = arith.constant dense<0.000000e+00> : vector<8x64xf32>
    %24 = tpu.matmul %13, %21, %cst_16 {dimension_numbers = #tpu.dot_dimension_numbers<[1], [1], [0], [0], [0, 0, 1, 0], [], []>} : vector<8x32xf32>, vector<64x32xf32>, vector<8x64xf32> -> vector<8x64xf32>
    %25 = tpu.iota {dimensions = array<i32: 0>} : vector<8x16xi32>
    %26 = tpu.iota {dimensions = array<i32: 1>} : vector<8x16xi32>
    %27 = arith.cmpi sgt, %26, %25 : vector<8x16xi32>
    %cst_17 = arith.constant -1.000000e+09 : f32
    %cst_18 = arith.constant 0.000000e+00 : f32
    %28 = vector.broadcast %cst_17 : f32 to vector<8x16xf32>
    %29 = vector.broadcast %cst_18 : f32 to vector<8x16xf32>
    %30 = arith.select %27, %28, %29 : vector<8x16xi1>, vector<8x16xf32>
    %31 = tpu.concatenate %30, %30, %30, %30 in 1 : vector<8x16xf32>, vector<8x16xf32>, vector<8x16xf32>, vector<8x16xf32> -> vector<8x64xf32>
    %32 = arith.addf %24, %31 : vector<8x64xf32>
    %cst_19 = arith.constant dense<0xFF800000> : vector<8xf32>
    %33 = vector.multi_reduction <maximumf>, %32, %cst_19 [1] : vector<8x64xf32> to vector<8xf32>
    %34 = vector.shape_cast %33 : vector<8xf32> to vector<8x1xf32>
    %35 = vector.broadcast %34 : vector<8x1xf32> to vector<8x64xf32>
    %36 = arith.subf %32, %35 : vector<8x64xf32>
    %37 = math.exp %36 : vector<8x64xf32>
    %cst_20 = arith.constant dense<0.000000e+00> : vector<8x32xf32>
    %38 = tpu.matmul %37, %5, %cst_20 {dimension_numbers = #tpu.dot_dimension_numbers<[1], [0], [0], [1], [0, 0, 1, 1], [], []>} : vector<8x64xf32>, vector<64x32xf32>, vector<8x32xf32> -> vector<8x32xf32>
    %cst_21 = arith.constant dense<0.000000e+00> : vector<8x32xf32>
    %39 = tpu.matmul %37, %23, %cst_21 {dimension_numbers = #tpu.dot_dimension_numbers<[1], [0], [0], [1], [0, 0, 1, 1], [], []>} : vector<8x64xf32>, vector<64x32xf32>, vector<8x32xf32> -> vector<8x32xf32>
    %40 = arith.divf %39, %38 : vector<8x32xf32>
    %c0_22 = arith.constant 0 : index
    %c0_23 = arith.constant 0 : index
    %41 = vector.load %arg3[%c0_22, %c0_23] : memref<160x128xf32, #tpu.memory_space<vmem>>, vector<32x128xf32>
    %c32_24 = arith.constant 32 : index
    %c0_25 = arith.constant 0 : index
    %42 = vector.load %arg3[%c32_24, %c0_25] : memref<160x128xf32, #tpu.memory_space<vmem>>, vector<128x128xf32>
    %cst_26 = arith.constant dense<0.000000e+00> : vector<8x128xf32>
    %43 = tpu.matmul %40, %41, %cst_26 {dimension_numbers = #tpu.dot_dimension_numbers<[1], [0], [0], [1], [0, 0, 1, 1], [], []>} : vector<8x32xf32>, vector<32x128xf32>, vector<8x128xf32> -> vector<8x128xf32>
    %44 = vector.broadcast %9 : vector<1x128xf32> to vector<8x128xf32>
    %45 = arith.addf %43, %44 : vector<8x128xf32>
    %cst_27 = arith.constant 0.000000e+00 : f32
    %46 = vector.broadcast %cst_27 : f32 to vector<8x128xf32>
    %47 = arith.maximumf %45, %46 : vector<8x128xf32>
    %cst_28 = arith.constant dense<0.000000e+00> : vector<8x128xf32>
    %48 = tpu.matmul %47, %42, %cst_28 {dimension_numbers = #tpu.dot_dimension_numbers<[1], [0], [0], [1], [0, 0, 1, 1], [], []>} : vector<8x128xf32>, vector<128x128xf32>, vector<8x128xf32> -> vector<8x128xf32>
    %49 = vector.broadcast %10 : vector<1x128xf32> to vector<8x128xf32>
    %50 = arith.addf %48, %49 : vector<8x128xf32>
    %c0_29 = arith.constant 0 : index
    %c0_30 = arith.constant 0 : index
    %51 = vector.load %arg5[%c0_29, %c0_30] : memref<8x128xf32, #tpu.memory_space<vmem>>, vector<8x128xf32>
    tpu.vector_store %arg5[%c0_29, %c0_30], %50 {strides = array<i32>} : memref<8x128xf32, #tpu.memory_space<vmem>>, vector<8x128xf32>,
    return
  }
}

</mosaic_0001>

<bundles_post_ra>
// kernel: tpu_custom_call.1
= control target key start
LH: loop header
LB: loop body
LE: loop exit
PB: predicated region body
PF: predicated region fallthrough
CT: control target
= control target key end

     0   :  { %vm135_vm0 = vcmask 392192   ;;  %v1036_v2 = vmov 0.0   ;;  %vm1037_vm1 = vmmov 0   ;;  %s1353_s0 = inlined_call_operand.vmem [shape: f32[8,32], index: 0, kind: input, shape index: {}]   ;;  %s1354_s1 = inlined_call_operand.vmem [shape: f32[16,48], index: 1, kind: input, shape index: {}]   ;;  %s1355_s2 = inlined_call_operand.vmem [shape: f32[192,32], index: 2, kind: input, shape index: {}]   ;;  %s1356_s3 = inlined_call_operand.vmem [shape: f32[160,128], index: 3, kind: input, shape index: {}]   ;;  %s1357_s4 = inlined_call_operand.vmem [shape: f32[5,128], index: 4, kind: input, shape index: {}]   ;;  %s1358_s5 = inlined_call_operand.hbm [shape: f32[8,128], index: 5, kind: output, shape index: {}]  }
   0x1   :  { %v33_v0 = vld [vmem:[%s1355_s2 + $0x48] sm:$0xff]  ;;  %v32_v1 = vld [vmem:[%s1355_s2 + $0x40] sm:$0xff]  ;;  %860 = vmatprep.subr.mxu0 %v1036_v2  ;;  %v31_v3 = vld [vmem:[%s1355_s2 + $0x38] sm:$0xff]  ;;  %868 = vmatprep.mubr.msk.f32.mxu0 %vm1037_vm1, %v1036_v2 }
   0x2   :  { %871 = vmatprep.subr.mxu1 %v33_v0  ;;  %v22_v4 = vld [vmem:[%s1354_s1] sm:$0xff]  ;;  %v27_v5 = vld [vmem:[%s1355_s2 + $0x18] sm:$0xff]  ;;  %v26_v6 = vld [vmem:[%s1355_s2 + $0x10] sm:$0xff] }
   0x3   :  { %872 = vmatpush3.msra.mxu1 %v33_v0  ;;  %883 = vmatprep.mubr.msk.f32.mxu1 %vm135_vm0, %v22_v4  ;;  %v30_v7 = vld [vmem:[%s1355_s2 + $0x30] sm:$0xff]  ;;  %v25_v8 = vld [vmem:[%s1355_s2 + $0x8] sm:$0xff] }
   0x4   :  { %873 = vmatprep.subr.mxu1 %v32_v1  ;;  %861 = vmatpush3.msra.mxu0 %v27_v5 }
   0x5   :  { %874 = vmatpush3.msra.mxu1 %v32_v1  ;;  %862 = vmatprep.subr.mxu0 %v1036_v2 }
   0x6   :  { %875 = vmatprep.subr.mxu1 %v31_v3 }
   0x7   :  { %10 = vsyncpa [#allocation3], 0  ;;  %876 = vmatpush3.msra.mxu1 %v31_v3  ;;  %v29_v9 = vld [vmem:[%s1355_s2 + $0x28] sm:$0xff]  ;;  %863 = vmatpush3.msra.mxu0 %v26_v6  ;;  %v24_v10 = vld [vmem:[%s1355_s2] sm:$0xff]  ;;  %vm57_vm2 = vcmask 261120   ;;  %v312_v14 = vlaneseq  ;;  %s1038_s25 = smov 16  }
   0x8   :  { %877 = vmatprep.subr.mxu1 %v30_v7  ;;  %864 = vmatprep.subr.mxu0 %v1036_v2  ;;  %v28_v11 = vld [vmem:[%s1355_s2 + $0x20] sm:$0xff]  ;;  %v23_v13 = vld [vmem:[%s1354_s1 + $0x8] sm:$0xff]  ;;  %v39_v15 = vld [vmem:[%s1355_s2 + $0x78] sm:$0xff]  ;;  %s1039_s26 = smov 48   ;;  %s1040_s6 = smov 32   ;;  %vm328_vm4 = vcmask 130048  }
   0x9   :  { %878 = vmatpush3.msra.mxu1 %v30_v7  ;;  %865 = vmatpush3.msra.mxu0 %v25_v8  ;;  %v21_v12 = vld [vmem:[%s1353_s0] sm:$0xff]  ;;  %v38_v16 = vld [vmem:[%s1355_s2 + $0x70] sm:$0xff]  ;;  %v313_v17 = vshrl.u32 %v312_v14, 7  ;;  %v315_v18 = vand.u32 127, %v312_v14  ;;  %v37_v19 = vld [vmem:[%s1355_s2 + $0x68] sm:$0xff]  ;;  %vm429_vm5 = vcmask 523264  }
   0xa   :  { %879 = vmatprep.subr.mxu1 %v29_v9  ;;  %866 = vmatprep.subr.mxu0 %v1036_v2  ;;  %v36_v21 = vld [vmem:[%s1355_s2 + $0x60] sm:$0xff]  ;;  %v35_v22 = vld [vmem:[%s1355_s2 + $0x58] sm:$0xff]  ;;  %v34_v23 = vld [vmem:[%s1355_s2 + $0x50] sm:$0xff]  ;;  %s1041_s17 = smov [#allocation2]  }
   0xb   :  { %880 = vmatpush3.msra.mxu1 %v29_v9  ;;  %867 = vmatpush3.msra.mxu0 %v24_v10  ;;  %vm316_vm3 = vcmp.gt.s32.totalorder %v315_v18, %v313_v17  ;;  %v770_v24 = vld [vmem:[%s1357_s4 + $0x1] ss:$0 sm:$0xff]  ;;  %v1158_v26 = vld [vmem:[%s1355_s2 + $0xb8] sm:$0xff]  ;;  %v1164_v32 = vld [vmem:[%s1355_s2 + $0xb0] sm:$0xff]  ;;  %s760_s18 = sshll.u32 %s1041_s17, 4  ;;  %s761_s18 = int_to_ptr.vmem [resolvable:$true] %s760_s18 }
   0xc   :  { %881 = vmatprep.subr.mxu1 %v28_v11  ;;  %869 = vmatmul.mubr.msk.f32.vlgmr.msra.gmra.mxu0 %vm57_vm2, %v21_v12  ;;  %v1134_v20 = vsel %vm316_vm3, -1e+09, %v1036_v2  ;;  %v1172_v35 = vld [vmem:[%s1355_s2 + $0xa8] sm:$0xff]  ;;  %v1180_v37 = vld [vmem:[%s1355_s2 + $0xa0] sm:$0xff]  ;;  %v1188_v39 = vld [vmem:[%s1355_s2 + $0x98] sm:$0xff]  ;;  %p1019_p1 = scmp.lt.s32.totalorder %s761_s18, %s761_s18 }
   0xd   :  { %882 = vmatpush3.msra.mxu1 %v28_v11  ;;  %898 = vmatprep.mubr.msk.f32.mxu0 %vm135_vm0, %v22_v4  ;;  %v1196_v41 = vld [vmem:[%s1355_s2 + $0x90] sm:$0xff]  ;;  %v1204_v43 = vld [vmem:[%s1355_s2 + $0x88] sm:$0xff]  ;;  %v40_v45 = vld [vmem:[%s1355_s2 + $0x80] sm:$0xff] }
   0xe   :  { %884 = vmatmul.mubr.msk.f32.vlgmr.msra.gmra.mxu1 %vm135_vm0, %v23_v13  ;;  %901 = vmatprep.subr.mxu1 %v1036_v2  ;;  %v768_v46 = vld [vmem:[%s1357_s4] ss:$0 sm:$0xff]  ;;  %v773_v60 = vld [vmem:[%s1357_s4 + $0x2] ss:$0 sm:$0xff]  ;;  %v583_v14 = vld [vmem:[%s1356_s3 + $0x10] sm:$0xff] }
   0xf   :  { %917 = vmatprep.mubr.msk.f32.mxu1 %vm1037_vm1, %v1036_v2  ;;  %886 = vmatprep.subr.mxu0 %v39_v15  ;;  %v600_v17 = vld [vmem:[%s1356_s3 + $0x98] sm:$0xff]  ;;  %v599_v18 = vld [vmem:[%s1356_s3 + $0x90] sm:$0xff] }
  0x10   :  { %887 = vmatpush3.msra.mxu0 %v39_v15  ;;  %319 = vrot.lane.b32.xlu0 %v1134_v20, %s1038_s25  ;;  %v582_v15 = vld [vmem:[%s1356_s3 + $0x8] sm:$0xff] }
  0x11   :  { %888 = vmatprep.subr.mxu0 %v38_v16  ;;  %325 = vrot.lane.b32.xlu1 %v1134_v20, %s1039_s26 }
  0x12   :  { %889 = vmatpush3.msra.mxu0 %v38_v16  ;;  %v581_v16 = vld [vmem:[%s1356_s3] sm:$0xff] }
  0x13   :  { %890 = vmatprep.subr.mxu0 %v37_v19 }
  0x14   :  { %891 = vmatpush3.msra.mxu0 %v37_v19  ;;  %322 = vrot.lane.b32.xlu0 %v1134_v20, %s1040_s6  ;;  %v598_v19 = vld [vmem:[%s1356_s3 + $0x88] sm:$0xff] }
  0x15   :  { %892 = vmatprep.subr.mxu0 %v36_v21 }
  0x16   :  { %893 = vmatpush3.msra.mxu0 %v36_v21  ;;  %v596_v21 = vld [vmem:[%s1356_s3 + $0x78] sm:$0xff] }
  0x17   :  { %894 = vmatprep.subr.mxu0 %v35_v22 }
  0x18   :  { %895 = vmatpush3.msra.mxu0 %v35_v22  ;;  %v595_v22 = vld [vmem:[%s1356_s3 + $0x70] sm:$0xff] }
  0x19   :  { %896 = vmatprep.subr.mxu0 %v34_v23 }
  0x1a   :  { %897 = vmatpush3.msra.mxu0 %v34_v23  ;;  %v594_v23 = vld [vmem:[%s1356_s3 + $0x68] sm:$0xff] }
  0x1b   :  { %899 = vmatmul.mubr.msk.f32.vlgmr.msra.gmra.mxu0 %vm135_vm0, %v23_v13  ;;  %939 = vmatprep.subr.mxu0 %v1036_v2  ;;  %v584_v13 = vld [vmem:[%s1356_s3 + $0x18] sm:$0xff] }
  0x1c   :  { %955 = vmatprep.mubr.msk.f32.mxu0 %vm1037_vm1, %v1036_v2 }
  0x82   :  { %v320_v49 = vpop.permute.xlu0 %319 }
  0x83   :  { %v329_v50 = vsel %vm328_vm4, %v1134_v20, %v320_v49  ;;  %v326_v53 = vpop.permute.xlu1 %325  ;;  %v597_v20 = vld [vmem:[%s1356_s3 + $0x80] sm:$0xff] }
  0x86   :  { %v323_v51 = vpop.permute.xlu0 %322 }
  0x87   :  { %v330_v52 = vsel %vm57_vm2, %v329_v50, %v323_v51 }
  0x88   :  { %v331_v54 = vsel %vm135_vm0, %v330_v52, %v326_v53 }
  0xcc   :  { %v127_v25 = vpop.f32.mrf.mxu0 }
  0xcd   :  { %v128_v48 = vadd.f32 %v768_v46, %v127_v25  ;;  %v592_v25 = vld [vmem:[%s1356_s3 + $0x58] sm:$0xff] }
  0xce   :  { %v885_v27 = vpop.f32.mrf.mxu1  ;;  %v870_v28 = vpop.f32.mrf.mxu0 }
  0xcf   :  { %v214_v29 = vadd.f32 %v885_v27, %v770_v24  ;;  %v590_v27 = vld [vmem:[%s1356_s3 + $0x48] sm:$0xff]  ;;  %v589_v28 = vld [vmem:[%s1356_s3 + $0x40] sm:$0xff] }
  0xd0   :  { %v208_v30 = vpop.f32.mrf.mxu1 }
  0xd1   :  { %v303_v31 = vmul.f32 %v214_v29, %v1158_v26  ;;  %v209_v33 = vadd.f32 %v770_v24, %v208_v30  ;;  %v301_v36 = vmul.f32 %v214_v29, %v1172_v35  ;;  %v299_v40 = vmul.f32 %v214_v29, %v1188_v39  ;;  %v593_v24 = vld [vmem:[%s1356_s3 + $0x60] sm:$0xff] }
  0xd2   :  { %v297_v44 = vmul.f32 %v214_v29, %v1204_v43  ;;  %v588_v29 = vld [vmem:[%s1356_s3 + $0x38] sm:$0xff] }
  0xd3   :  { %902 = vmatpush3.xpose.msk.msra.mxu1 %vm57_vm2, %v303_v31  ;;  %v302_v34 = vmul.f32 %v209_v33, %v1164_v32  ;;  %v300_v38 = vmul.f32 %v209_v33, %v1180_v37  ;;  %v298_v42 = vmul.f32 %v209_v33, %v1196_v41  ;;  %v296_v47 = vmul.f32 %v209_v33, %v40_v45 }
  0xd4   :  { %903 = vmatprep.subr.mxu1 %v1036_v2 }
  0xd7   :  { %904 = vmatpush3.xpose.msk.msra.mxu1 %vm57_vm2, %v302_v34 }
  0xd8   :  { %905 = vmatprep.subr.mxu1 %v1036_v2 }
  0xdb   :  { %906 = vmatpush3.xpose.msk.msra.mxu1 %vm57_vm2, %v301_v36  ;;  %v900_v59 = vpop.f32.mrf.mxu0  ;;  %v587_v36 = vld [vmem:[%s1356_s3 + $0x30] sm:$0xff] }
  0xdc   :  { %907 = vmatprep.subr.mxu1 %v1036_v2  ;;  %v293_v61 = vadd.f32 %v900_v59, %v773_v60 }
  0xdd   :  { %v287_v62 = vpop.f32.mrf.mxu0 }
  0xde   :  { %v288_v63 = vadd.f32 %v773_v60, %v287_v62  ;;  %v311_v0 = vmul.f32 %v293_v61, %v1158_v26  ;;  %v309_v3 = vmul.f32 %v293_v61, %v1172_v35  ;;  %v307_v5 = vmul.f32 %v293_v61, %v1188_v39 }
  0xdf   :  { %908 = vmatpush3.xpose.msk.msra.mxu1 %vm57_vm2, %v300_v38  ;;  %v305_v7 = vmul.f32 %v293_v61, %v1204_v43  ;;  %v585_v38 = vld [vmem:[%s1356_s3 + $0x20] sm:$0xff] }
  0xe0   :  { %909 = vmatprep.subr.mxu1 %v1036_v2  ;;  %940 = vmatpush3.msra.mxu0 %v311_v0  ;;  %v310_v1 = vmul.f32 %v288_v63, %v1164_v32  ;;  %v308_v4 = vmul.f32 %v288_v63, %v1180_v37  ;;  %v306_v6 = vmul.f32 %v288_v63, %v1196_v41 }
  0xe1   :  { %941 = vmatprep.subr.mxu0 %v1036_v2  ;;  %v304_v8 = vmul.f32 %v288_v63, %v40_v45 }
  0xe2   :  { %942 = vmatpush3.msra.mxu0 %v310_v1 }
  0xe3   :  { %910 = vmatpush3.xpose.msk.msra.mxu1 %vm57_vm2, %v299_v40  ;;  %943 = vmatprep.subr.mxu0 %v1036_v2 }
  0xe4   :  { %911 = vmatprep.subr.mxu1 %v1036_v2  ;;  %944 = vmatpush3.msra.mxu0 %v309_v3 }
  0xe5   :  { %945 = vmatprep.subr.mxu0 %v1036_v2 }
  0xe6   :  { %946 = vmatpush3.msra.mxu0 %v308_v4 }
  0xe7   :  { %912 = vmatpush3.xpose.msk.msra.mxu1 %vm57_vm2, %v298_v42  ;;  %947 = vmatprep.subr.mxu0 %v1036_v2 }
  0xe8   :  { %913 = vmatprep.subr.mxu1 %v1036_v2  ;;  %948 = vmatpush3.msra.mxu0 %v307_v5 }
  0xe9   :  { %949 = vmatprep.subr.mxu0 %v1036_v2 }
  0xea   :  { %950 = vmatpush3.msra.mxu0 %v306_v6 }
  0xeb   :  { %914 = vmatpush3.xpose.msk.msra.mxu1 %vm57_vm2, %v297_v44  ;;  %951 = vmatprep.subr.mxu0 %v1036_v2  ;;  %v789_v44 = vld [vmem:[%s1357_s4 + $0x4] ss:$0 sm:$0xff] }
  0xec   :  { %915 = vmatprep.subr.mxu1 %v1036_v2  ;;  %952 = vmatpush3.msra.mxu0 %v305_v7 }
  0xed   :  { %953 = vmatprep.subr.mxu0 %v1036_v2 }
  0xee   :  { %954 = vmatpush3.msra.mxu0 %v304_v8 }
  0xef   :  { %916 = vmatpush3.xpose.msk.msra.mxu1 %vm57_vm2, %v296_v47  ;;  %969 = vmatprep.subr.mxu0 %v1036_v2 }
  0xf0   :  { %920 = vmatprep.subr.mxu1 %v1036_v2 }
  0xf2   :  { %918 = vmatmul.mubr.msk.f32.vlgmr.msra.gmra.mxu1 %vm57_vm2, %v128_v48 }
  0xf3   :  { %921 = vmatpush3.msra.mxu1 %v1158_v26  ;;  %936 = vmatprep.mubr.msk.f32.mxu1 %vm1037_vm1, %v1036_v2  ;;  %v591_v26 = vld [vmem:[%s1356_s3 + $0x50] sm:$0xff] }
  0xf4   :  { %922 = vmatprep.subr.mxu1 %v1036_v2 }
  0xf5   :  { %923 = vmatpush3.msra.mxu1 %v1164_v32 }
  0xf6   :  { %924 = vmatprep.subr.mxu1 %v1036_v2 }
  0xf7   :  { %925 = vmatpush3.msra.mxu1 %v1172_v35 }
  0xf8   :  { %926 = vmatprep.subr.mxu1 %v1036_v2 }
  0xf9   :  { %927 = vmatpush3.msra.mxu1 %v1180_v37  ;;  %v586_v37 = vld [vmem:[%s1356_s3 + $0x28] sm:$0xff]  ;;  %s1014_s3 = scalar_lea.vmem %s761_s18, 128 }
  0xfa   :  { %928 = vmatprep.subr.mxu1 %v1036_v2  ;;  %p1015_p0 = scmp.ne.s32.totalorder %s761_s18, %s1014_s3  ;;  %p1020_p2 = scmp.lt.s32.totalorder %s1014_s3, %s1014_s3 }
  0xfb   :  { %929 = vmatpush3.msra.mxu1 %v1188_v39  ;;  %v787_v39 = vld [vmem:[%s1357_s4 + $0x3] ss:$0 sm:$0xff] }
  0xfc   :  { %930 = vmatprep.subr.mxu1 %v1036_v2  ;;  %p1021_p3 = por %p1020_p2, %p1019_p1 }
  0xfd   :  { %931 = vmatpush3.msra.mxu1 %v1196_v41 }
  0xfe   :  { %932 = vmatprep.subr.mxu1 %v1036_v2  ;;  %p1022_p4 = pnand %p1021_p3, %p1015_p0 }
  0xff   :  { %933 = vmatpush3.msra.mxu1 %v1204_v43 }
 0x100   :  { %934 = vmatprep.subr.mxu1 %v1036_v2 }
 0x101   :  { %935 = vmatpush3.msra.mxu1 %v40_v45 }
 0x102   :  { %958 = vmatprep.subr.mxu1 %v1036_v2 }
 0x1b2   :  { %v425_v55 = vpop.f32.mrf.mxu1 }
 0x1b3   :  { %v426_v56 = vadd.f32 %v425_v55, %v331_v54 }
 0x1b4   :  { %v919_v57 = vpop.f32.mrf.mxu1 }
 0x1b5   :  { %v430_v58 = vsel %vm429_vm5, %v426_v56, -inf }
 0x1b6   :  { %431 = vmax.xlane.f32.xlu1 %v430_v58 }
 0x23f   :  { %v432_v9 = vpop.xlane.xlu1 %431 }
 0x240   :  { %v433_v10 = vsub.f32 %v426_v56, %v432_v9 }
 0x242   :  { %v434_v11 = vmul.f32 1.442695, %v433_v10 }
 0x244   :  { %1010 = vpow2.f32 %v434_v11 }
 0x251   :  { %v1011_v12 = vpop.eup %1010 }
 0x252   :  { %937 = vmatmul.mubr.msk.f32.vlgmr.msra.gmra.mxu1 %vm429_vm5, %v1011_v12  ;;  %956 = vmatmul.mubr.msk.f32.vlgmr.msra.gmra.mxu0 %vm429_vm5, %v1011_v12 }
 0x253   :  { %966 = vmatprep.mubr.msk.f32.mxu1 %vm1037_vm1, %v1036_v2  ;;  %1001 = vmatprep.mubr.msk.f32.mxu0 %vm1037_vm1, %v1036_v2 }
 0x254   :  { %959 = vmatpush3.msra.mxu1 %v584_v13  ;;  %970 = vmatpush3.msra.mxu0 %v600_v17 }
 0x255   :  { %960 = vmatprep.subr.mxu1 %v1036_v2  ;;  %971 = vmatprep.subr.mxu0 %v1036_v2 }
 0x256   :  { %961 = vmatpush3.msra.mxu1 %v583_v14  ;;  %972 = vmatpush3.msra.mxu0 %v599_v18 }
 0x257   :  { %962 = vmatprep.subr.mxu1 %v1036_v2  ;;  %973 = vmatprep.subr.mxu0 %v1036_v2 }
 0x258   :  { %963 = vmatpush3.msra.mxu1 %v582_v15  ;;  %974 = vmatpush3.msra.mxu0 %v598_v19 }
 0x259   :  { %964 = vmatprep.subr.mxu1 %v1036_v2  ;;  %975 = vmatprep.subr.mxu0 %v1036_v2 }
 0x25a   :  { %965 = vmatpush3.msra.mxu1 %v581_v16  ;;  %976 = vmatpush3.msra.mxu0 %v597_v20 }
 0x25b   :  { %977 = vmatprep.subr.mxu0 %v1036_v2 }
 0x25c   :  { %978 = vmatpush3.msra.mxu0 %v596_v21 }
 0x25d   :  { %979 = vmatprep.subr.mxu0 %v1036_v2 }
 0x25e   :  { %980 = vmatpush3.msra.mxu0 %v595_v22 }
 0x25f   :  { %981 = vmatprep.subr.mxu0 %v1036_v2 }
 0x260   :  { %982 = vmatpush3.msra.mxu0 %v594_v23 }
 0x261   :  { %983 = vmatprep.subr.mxu0 %v1036_v2 }
 0x262   :  { %984 = vmatpush3.msra.mxu0 %v593_v24 }
 0x263   :  { %985 = vmatprep.subr.mxu0 %v1036_v2 }
 0x264   :  { %986 = vmatpush3.msra.mxu0 %v592_v25 }
 0x265   :  { %987 = vmatprep.subr.mxu0 %v1036_v2 }
 0x266   :  { %988 = vmatpush3.msra.mxu0 %v591_v26 }
 0x267   :  { %989 = vmatprep.subr.mxu0 %v1036_v2 }
 0x268   :  { %990 = vmatpush3.msra.mxu0 %v590_v27 }
 0x269   :  { %991 = vmatprep.subr.mxu0 %v1036_v2 }
 0x26a   :  { %992 = vmatpush3.msra.mxu0 %v589_v28 }
 0x26b   :  { %993 = vmatprep.subr.mxu0 %v1036_v2 }
 0x26c   :  { %994 = vmatpush3.msra.mxu0 %v588_v29 }
 0x26d   :  { %995 = vmatprep.subr.mxu0 %v1036_v2 }
 0x26e   :  { %996 = vmatpush3.msra.mxu0 %v587_v36 }
 0x26f   :  { %997 = vmatprep.subr.mxu0 %v1036_v2 }
 0x270   :  { %998 = vmatpush3.msra.mxu0 %v586_v37 }
 0x271   :  { %999 = vmatprep.subr.mxu0 %v1036_v2 }
 0x272   :  { %1000 = vmatpush3.msra.mxu0 %v585_v38 }
 0x312   :  { %v505_v30 = vpop.f32.mrf.mxu1  ;;  %v575_v31 = vpop.f32.mrf.mxu0 }
 0x313   :  { %1012 = vrcp.f32 %v505_v30 }
 0x314   :  { %v938_v32 = vpop.f32.mrf.mxu1  ;;  %v957_v33 = vpop.f32.mrf.mxu0 }
 0x320   :  { %v1013_v34 = vpop.eup %1012 }
 0x321   :  { %v580_v35 = vmul.f32 %v1013_v34, %v575_v31 }
 0x323   :  { %967 = vmatmul.mubr.msk.f32.vlgmr.msra.gmra.mxu1 %vm57_vm2, %v580_v35 }
 0x3e3   :  { %v674_v40 = vpop.f32.mrf.mxu1 }
 0x3e4   :  { %v675_v41 = vadd.f32 %v787_v39, %v674_v40 }
 0x3e5   :  { %v968_v42 = vpop.f32.mrf.mxu1 }
 0x3e6   :  { %v678_v43 = vmax.f32 %v675_v41, 0.0 }
 0x3e8   :  { %1002 = vmatmul.mubr.f32.vlgmr.msra.gmra.mxu0 %v678_v43 }
 0x4a8   :  { %v749_v45 = vpop.f32.mrf.mxu0 }
 0x4a9   :  { %v750_v46 = vadd.f32 %v789_v44, %v749_v45 }
 0x4aa   :  { %v1003_v2 = vpop.f32.mrf.mxu0 }
 0x4ab   :  { %753 = vst [vmem:[#allocation2] sm:$0xff] %v750_v46 }
 0x4ac   :  { %1025 = shalt.err (!%p1022_p4)
}
 0x4ad   :  { %763 = dma.vmem_to_hbm [thread:$0]  %s761_s18, 128, %s1358_s5, [#allocation3]  }
 0x4ae   :  { %1034 = dma.done.wait [#allocation3], 128  }
 0x4af   :  { %1035 = vsyncadd [#allocation3], 4294967168 }
 0x4b0   :  { %767 = vsyncpa [#allocation3], 1 }

</bundles_post_ra>
